<compile_context>
chip_gen: v7x
topology: tpu7x:2x2x1
jax: 0.10.0
libtpu: 0.0.40
codegen_flags: <defaults>
</compile_context>

<pallas_src>
import functools

import jax
import jax.numpy as jnp
import numpy as np
from jax import lax
from jax.experimental import pallas as pl
from jax.experimental.pallas import tpu as pltpu

_EPS = 1e-5


def _bilinear_matrix(out_size, in_size):
    """(out, in) interpolation matrix for 1-D bilinear, align_corners=True."""
    if in_size == 1:
        return jnp.ones((out_size, 1), jnp.float32)
    i = jnp.arange(out_size, dtype=jnp.float32)
    src = i * (in_size - 1) / (out_size - 1)
    lo = jnp.clip(jnp.floor(src).astype(jnp.int32), 0, in_size - 2)
    frac = src - lo.astype(jnp.float32)
    A = jnp.zeros((out_size, in_size), jnp.float32)
    A = A.at[jnp.arange(out_size), lo].add(1.0 - frac)
    A = A.at[jnp.arange(out_size), lo + 1].add(frac)
    return A


def _pick_tile_h(H2, W2, cin, cmid):
    """Row-tile: divisor of H2 whose flattened tile is a multiple of 128 lanes
    and whose largest in-kernel im2col slab stays around ~4 MiB."""
    per_row_bytes = 9 * max(cin, cmid) * W2 * 4
    target_rows = max(2, (4 << 20) // max(per_row_bytes, 1))
    cands = [d for d in range(2, H2 + 1)
             if H2 % d == 0 and (d * W2) % 128 == 0]
    if not cands:
        return H2                       # whole-image tile is always legal
    fitting = [d for d in cands if d <= target_rows]
    return max(fitting) if fitting else min(cands)


def _doubleconv_kernel(prev_ref, cur_ref, next_ref, w1_ref, s1_ref, t1_ref,
                       w2_ref, s2_ref, t2_ref, o_ref, *, w_img, tile_s):
    """Fused DoubleConv on one (batch n, row-tile i) block.

    Activations are channel-major (C, rows*W) with the flattened spatial axis
    in lanes.  prev/cur/next are the same image passed at row-tile indices
    i-1 / i / i+1 (clamped) so the conv halos are available.
    """
    W = w_img
    i = pl.program_id(1)
    nt = pl.num_programs(1)
    cdt = cur_ref.dtype

    L1 = tile_s + 4 * W                 # conv1 input slab (TILE_H + 4 rows)
    L2 = tile_s + 2 * W                 # conv1 output / conv2 input (TILE_H + 2 rows)

    cur = cur_ref[0]                                   # (Cin, tile_s)
    halo_top = prev_ref[0, :, tile_s - 2 * W:]         # last 2 rows of prev tile
    halo_bot = next_ref[0, :, :2 * W]                  # first 2 rows of next tile
    zeros2 = jnp.zeros_like(halo_top)
    halo_top = jnp.where(i == 0, zeros2, halo_top)     # image top -> zero padding
    halo_bot = jnp.where(i == nt - 1, zeros2, halo_bot)
    slab1 = jnp.concatenate([halo_top, cur, halo_bot], axis=-1)   # (Cin, L1)

    def shifted(x, L):
        """(dx=-1, dx=0, dx=+1) column-shifted copies, zero at row ends."""
        C = x.shape[0]
        col = lax.broadcasted_iota(jnp.int32, (1, L), 1) % W
        zcol = jnp.zeros((C, 1), x.dtype)
        xm = jnp.where(col >= 1,
                       jnp.concatenate([zcol, x[:, :L - 1]], axis=-1), 0)
        xp = jnp.where(col <= W - 2,
                       jnp.concatenate([x[:, 1:], zcol], axis=-1), 0)
        return (xm, x, xp)

    def im2col(x_by_dx, out_len):
        """Stack the 9 taps along the contraction (sublane) axis."""
        cols = []
        for dy in (-1, 0, 1):
            start = (1 + dy) * W
            for dx in (-1, 0, 1):
                cols.append(x_by_dx[dx + 1][:, start:start + out_len])
        return jnp.concatenate(cols, axis=0)           # (9*C, out_len)

    # conv1 (on concat'ed channels), computed over TILE_H + 2 rows so conv2's
    # halo is available without fetching neighbours' h1 (recompute-at-edges).
    acc1 = jnp.dot(w1_ref[...], im2col(shifted(slab1, L1), L2),
                   preferred_element_type=jnp.float32)              # (Cmid, L2)
    h1 = jnp.maximum(acc1 * s1_ref[...] + t1_ref[...], 0.0)         # folded BN + ReLU

    # rows that fall outside the image act as conv2's zero padding
    pos = lax.broadcasted_iota(jnp.int32, (1, L2), 1)
    keep = ((i > 0) | (pos >= W)) & ((i < nt - 1) | (pos < L2 - W))
    h1 = jnp.where(keep, h1, 0.0).astype(cdt)

    # conv2
    acc2 = jnp.dot(w2_ref[...], im2col(shifted(h1, L2), tile_s),
                   preferred_element_type=jnp.float32)              # (Cout, tile_s)
    out = jnp.maximum(acc2 * s2_ref[...] + t2_ref[...], 0.0)
    o_ref[0] = out.astype(o_ref.dtype)


def up_forward(x1, x2, params, *, compute_dtype=jnp.bfloat16, tile_h=None):
    """x1, x2: NCHW float32. Returns NCHW output of Up(bilinear=True)."""
    N, C1, H1, W1 = x1.shape
    N2, C2, H2, W2 = x2.shape
    assert N == N2
    Cin = C1 + C2
    Cmid = params["w1"].shape[0]
    Cout = params["w2"].shape[0]
    Hu, Wu = 2 * H1, 2 * W1
    diffY, diffX = H2 - Hu, W2 - Wu
    assert diffY >= 0 and diffX >= 0

    # --- wrapper glue: separable bilinear upsample + F.pad + channel concat ---
    Ah = _bilinear_matrix(Hu, H1)
    Aw = _bilinear_matrix(Wu, W1)
    Ah_pad = jnp.zeros((H2, H1), jnp.float32).at[diffY // 2: diffY // 2 + Hu].set(Ah)
    Aw_pad = jnp.zeros((W2, W1), jnp.float32).at[diffX // 2: diffX // 2 + Wu].set(Aw)
    up = jnp.einsum("oh,nchw->ncow", Ah_pad, x1)
    up = jnp.einsum("pw,ncow->ncop", Aw_pad, up)                    # (N, C1, H2, W2)
    cat = jnp.concatenate([x2, up], axis=1)                         # (N, Cin, H2, W2)
    S2 = H2 * W2
    cat = cat.reshape(N, Cin, S2).astype(compute_dtype)             # lane-dense spatial

    # fold conv bias + eval-mode BN into per-channel scale / shift
    def fold(b, gamma, beta, mean, var):
        s = gamma / jnp.sqrt(var + _EPS)
        return s, (b - mean) * s + beta

    s1, t1 = fold(params["b1"], params["gamma1"], params["beta1"],
                  params["mean1"], params["var1"])
    s2, t2 = fold(params["b2"], params["gamma2"], params["beta2"],
                  params["mean2"], params["var2"])

    # (O, I, 3, 3) -> (O, 9*I), matching im2col order (dy outer, dx, channel inner)
    w1f = jnp.transpose(params["w1"], (0, 2, 3, 1)).reshape(Cmid, 9 * Cin)
    w2f = jnp.transpose(params["w2"], (0, 2, 3, 1)).reshape(Cout, 9 * Cmid)
    w1f = w1f.astype(compute_dtype)
    w2f = w2f.astype(compute_dtype)

    TILE_H = _pick_tile_h(H2, W2, Cin, Cmid) if tile_h is None else int(tile_h)
    if H2 % TILE_H != 0 or TILE_H < 2:
        raise ValueError(f"bad tile_h={TILE_H} for H2={H2}")
    TILE_S = TILE_H * W2
    if not (TILE_S == S2 or TILE_S % 128 == 0):
        raise ValueError(f"tile_h*W2={TILE_S} must be a multiple of 128 or the full image")
    num_tiles = H2 // TILE_H

    kern = functools.partial(_doubleconv_kernel, w_img=W2, tile_s=TILE_S)
    cat_spec = lambda f: pl.BlockSpec((1, Cin, TILE_S), f)

    out_flat = pl.pallas_call(
        kern,
        out_shape=jax.ShapeDtypeStruct((N, Cout, S2), jnp.float32),
        grid_spec=pltpu.PrefetchScalarGridSpec(
            num_scalar_prefetch=0,
            grid=(N, num_tiles),
            in_specs=[
                cat_spec(lambda n, i: (n, 0, jnp.maximum(i - 1, 0))),          # prev tile (halo)
                cat_spec(lambda n, i: (n, 0, i)),                              # current tile
                cat_spec(lambda n, i: (n, 0, jnp.minimum(i + 1, num_tiles - 1))),  # next tile (halo)
                pl.BlockSpec((Cmid, 9 * Cin), lambda n, i: (0, 0)),
                pl.BlockSpec((Cmid, 1), lambda n, i: (0, 0)),
                pl.BlockSpec((Cmid, 1), lambda n, i: (0, 0)),
                pl.BlockSpec((Cout, 9 * Cmid), lambda n, i: (0, 0)),
                pl.BlockSpec((Cout, 1), lambda n, i: (0, 0)),
                pl.BlockSpec((Cout, 1), lambda n, i: (0, 0)),
            ],
            out_specs=pl.BlockSpec((1, Cout, TILE_S), lambda n, i: (n, 0, i)),
        ),
        compiler_params=pltpu.CompilerParams(
            dimension_semantics=("parallel", "parallel")),
    )(cat, cat, cat, w1f, s1[:, None], t1[:, None], w2f, s2[:, None], t2[:, None])

    return out_flat.reshape(N, Cout, H2, W2)            # already NCHW, no transpose


def up_forward_ref(x1, x2, params, *, conv_dtype=jnp.float32):
    """Pure-JAX reference (NCHW), mirrors the PyTorch forward (eval-mode BN).
    conv_dtype=bfloat16 mimics the kernel's bf16-input / f32-accum matmuls."""
    _, _, H1, W1 = x1.shape
    _, _, H2, W2 = x2.shape
    Ah = _bilinear_matrix(2 * H1, H1)
    Aw = _bilinear_matrix(2 * W1, W1)
    up = jnp.einsum("oh,nchw->ncow", Ah, x1)
    up = jnp.einsum("pw,ncow->ncop", Aw, up)
    diffY, diffX = H2 - up.shape[2], W2 - up.shape[3]
    up = jnp.pad(up, ((0, 0), (0, 0),
                      (diffY // 2, diffY - diffY // 2),
                      (diffX // 2, diffX - diffX // 2)))
    x = jnp.concatenate([x2, up], axis=1)

    def conv_bn_relu(x, w, b, gamma, beta, mean, var):
        y = lax.conv_general_dilated(
            x.astype(conv_dtype), w.astype(conv_dtype), (1, 1), "SAME",
            dimension_numbers=("NCHW", "OIHW", "NCHW"),
            preferred_element_type=jnp.float32)
        y = y + b[None, :, None, None]
        y = (y - mean[None, :, None, None]) / jnp.sqrt(var[None, :, None, None] + _EPS)
        y = y * gamma[None, :, None, None] + beta[None, :, None, None]
        return jnp.maximum(y, 0.0)

    y = conv_bn_relu(x, params["w1"], params["b1"], params["gamma1"],
                     params["beta1"], params["mean1"], params["var1"])
    y = conv_bn_relu(y, params["w2"], params["b2"], params["gamma2"],
                     params["beta2"], params["mean2"], params["var2"])
    return y


if __name__ == "__main__":
    # Up(in_channels=8, out_channels=4, bilinear=True) -> DoubleConv(8, 4, mid=4)
    in_channels, out_channels = 8, 4
    mid_channels = in_channels // 2
    N = 2
    C1 = in_channels // 2          # x1 channels (decoder path)
    C2 = in_channels - C1          # x2 channels (skip connection); cat -> in_channels
    H1 = W1 = 8
    H2 = W2 = 16

    key = jax.random.PRNGKey(0)
    ks = jax.random.split(key, 14)
    x1 = jax.random.normal(ks[0], (N, C1, H1, W1), jnp.float32)
    x2 = jax.random.normal(ks[1], (N, C2, H2, W2), jnp.float32)

    params = dict(
        w1=0.2 * jax.random.normal(ks[2], (mid_channels, in_channels, 3, 3), jnp.float32),
        b1=0.1 * jax.random.normal(ks[3], (mid_channels,), jnp.float32),
        gamma1=1.0 + 0.1 * jax.random.normal(ks[4], (mid_channels,), jnp.float32),
        beta1=0.1 * jax.random.normal(ks[5], (mid_channels,), jnp.float32),
        mean1=0.1 * jax.random.normal(ks[6], (mid_channels,), jnp.float32),
        var1=jax.random.uniform(ks[7], (mid_channels,), jnp.float32, 0.5, 1.5),
        w2=0.2 * jax.random.normal(ks[8], (out_channels, mid_channels, 3, 3), jnp.float32),
        b2=0.1 * jax.random.normal(ks[9], (out_channels,), jnp.float32),
        gamma2=1.0 + 0.1 * jax.random.normal(ks[10], (out_channels,), jnp.float32),
        beta2=0.1 * jax.random.normal(ks[11], (out_channels,), jnp.float32),
        mean2=0.1 * jax.random.normal(ks[12], (out_channels,), jnp.float32),
        var2=jax.random.uniform(ks[13], (out_channels,), jnp.float32, 0.5, 1.5),
    )

    # 1) f32 compute path (exact spec math), multi-tile grid (exercises the halo logic)
    out_f32 = jax.block_until_ready(
        up_forward(x1, x2, params, compute_dtype=jnp.float32, tile_h=8))
    ref_f32 = jax.block_until_ready(up_forward_ref(x1, x2, params))
    assert out_f32.shape == (N, out_channels, H2, W2), out_f32.shape
    np.testing.assert_allclose(np.asarray(out_f32), np.asarray(ref_f32),
                               rtol=2e-3, atol=2e-3)

    # 2) bf16 compute path (performance default), multi-tile and whole-image grids,
    #    checked against a reference that quantizes conv inputs identically.
    ref_bf16 = jax.block_until_ready(
        up_forward_ref(x1, x2, params, conv_dtype=jnp.bfloat16))
    out_bf16_tiled = jax.block_until_ready(up_forward(x1, x2, params, tile_h=8))
    out_bf16_full = jax.block_until_ready(up_forward(x1, x2, params))
    np.testing.assert_allclose(np.asarray(out_bf16_tiled), np.asarray(ref_bf16),
                               rtol=5e-3, atol=5e-3)
    np.testing.assert_allclose(np.asarray(out_bf16_full), np.asarray(ref_bf16),
                               rtol=5e-3, atol=5e-3)

    print("KERNEL_OK")
</pallas_src>

<mosaic_0001>
module attributes {stable_mosaic.version = 11 : i64} {
  func.func @_doubleconv_kernel(%arg0: i32, %arg1: i32, %arg2: memref<1x8x128xf32, #tpu.memory_space<vmem>>, %arg3: memref<1x8x128xf32, #tpu.memory_space<vmem>>, %arg4: memref<1x8x128xf32, #tpu.memory_space<vmem>>, %arg5: memref<4x72xf32, #tpu.memory_space<vmem>>, %arg6: memref<4x1xf32, #tpu.memory_space<vmem>>, %arg7: memref<4x1xf32, #tpu.memory_space<vmem>>, %arg8: memref<4x36xf32, #tpu.memory_space<vmem>>, %arg9: memref<4x1xf32, #tpu.memory_space<vmem>>, %arg10: memref<4x1xf32, #tpu.memory_space<vmem>>, %arg11: memref<1x4x128xf32, #tpu.memory_space<vmem>>) attributes {dimension_semantics = [#tpu.dimension_semantics<parallel>, #tpu.dimension_semantics<parallel>], iteration_bounds = array<i64: 2, 2>, scalar_prefetch = 0 : i64, scratch_operands = 0 : i64, tpu.core_type = #tpu.core_type<tc>, window_params = [{transform_indices = @transform_0, window_bounds = array<i64: 1, 8, 128>}, {transform_indices = @transform_1, window_bounds = array<i64: 1, 8, 128>}, {transform_indices = @transform_2, window_bounds = array<i64: 1, 8, 128>}, {pipeline_mode = #tpu.pipeline_mode<synchronous>, transform_indices = @transform_3, window_bounds = array<i64: 4, 72>}, {pipeline_mode = #tpu.pipeline_mode<synchronous>, transform_indices = @transform_4, window_bounds = array<i64: 4, 1>}, {pipeline_mode = #tpu.pipeline_mode<synchronous>, transform_indices = @transform_5, window_bounds = array<i64: 4, 1>}, {pipeline_mode = #tpu.pipeline_mode<synchronous>, transform_indices = @transform_6, window_bounds = array<i64: 4, 36>}, {pipeline_mode = #tpu.pipeline_mode<synchronous>, transform_indices = @transform_7, window_bounds = array<i64: 4, 1>}, {pipeline_mode = #tpu.pipeline_mode<synchronous>, transform_indices = @transform_8, window_bounds = array<i64: 4, 1>}, {transform_indices = @transform_9, window_bounds = array<i64: 1, 4, 128>}]} {
    %c0 = arith.constant 0 : index
    %c0_0 = arith.constant 0 : index
    %c0_1 = arith.constant 0 : index
    %0 = vector.load %arg3[%c0, %c0_0, %c0_1] : memref<1x8x128xf32, #tpu.memory_space<vmem>>, vector<1x8x128xf32>
    %1 = vector.shape_cast %0 : vector<1x8x128xf32> to vector<8x128xf32>
    %c0_2 = arith.constant 0 : index
    %c0_3 = arith.constant 0 : index
    %c96 = arith.constant 96 : index
    %2 = vector.load %arg2[%c0_2, %c0_3, %c96] : memref<1x8x128xf32, #tpu.memory_space<vmem>>, vector<1x8x32xf32>
    %3 = vector.shape_cast %2 : vector<1x8x32xf32> to vector<8x32xf32>
    %c0_4 = arith.constant 0 : index
    %c0_5 = arith.constant 0 : index
    %c0_6 = arith.constant 0 : index
    %4 = vector.load %arg4[%c0_4, %c0_5, %c0_6] : memref<1x8x128xf32, #tpu.memory_space<vmem>>, vector<1x8x32xf32>
    %5 = vector.shape_cast %4 : vector<1x8x32xf32> to vector<8x32xf32>
    %cst = arith.constant 0.000000e+00 : f32
    %6 = vector.broadcast %cst : f32 to vector<8x32xf32>
    %c0_i32 = arith.constant 0 : i32
    %7 = arith.cmpi eq, %arg1, %c0_i32 : i32
    %8 = arith.select %7, %6, %3 : vector<8x32xf32>
    %c1_i32 = arith.constant 1 : i32
    %9 = arith.cmpi eq, %arg1, %c1_i32 : i32
    %10 = arith.select %9, %6, %5 : vector<8x32xf32>
    %11 = tpu.concatenate %8, %1, %10 in 1 : vector<8x32xf32>, vector<8x128xf32>, vector<8x32xf32> -> vector<8x192xf32>
    %c0_7 = arith.constant 0 : index
    %c0_8 = arith.constant 0 : index
    %12 = vector.load %arg5[%c0_7, %c0_8] : memref<4x72xf32, #tpu.memory_space<vmem>>, vector<4x72xf32>
    %13 = tpu.iota {dimensions = array<i32: 1>} : vector<1x192xi32>
    %c16_i32 = arith.constant 16 : i32
    %c0_i32_9 = arith.constant 0 : i32
    %14 = arith.cmpi eq, %c16_i32, %c0_i32_9 : i32
    %c1_i32_10 = arith.constant 1 : i32
    %15 = arith.select %14, %c1_i32_10, %c16_i32 : i32
    %16 = vector.broadcast %15 : i32 to vector<1x192xi32>
    %17 = arith.remsi %13, %16 : vector<1x192xi32>
    %c0_i32_11 = arith.constant 0 : i32
    %18 = vector.broadcast %c0_i32_11 : i32 to vector<1x192xi32>
    %19 = arith.cmpi ne, %17, %18 : vector<1x192xi32>
    %c0_i32_12 = arith.constant 0 : i32
    %20 = vector.broadcast %c0_i32_12 : i32 to vector<1x192xi32>
    %21 = arith.cmpi slt, %17, %20 : vector<1x192xi32>
    %c0_i32_13 = arith.constant 0 : i32
    %22 = arith.cmpi slt, %15, %c0_i32_13 : i32
    %23 = vector.broadcast %22 : i1 to vector<1x192xi1>
    %24 = vector.broadcast %23 : vector<1x192xi1> to vector<1x192xi1>
    %25 = arith.xori %21, %24 : vector<1x192xi1>
    %26 = arith.andi %25, %19 : vector<1x192xi1>
    %27 = vector.broadcast %15 : i32 to vector<1x192xi32>
    %28 = arith.addi %17, %27 : vector<1x192xi32>
    %29 = arith.select %26, %28, %17 : vector<1x192xi1>, vector<1x192xi32>
    %cst_14 = arith.constant 0.000000e+00 : f32
    %30 = vector.broadcast %cst_14 : f32 to vector<8x1xf32>
    %c1_i32_15 = arith.constant 1 : i32
    %31 = vector.broadcast %c1_i32_15 : i32 to vector<1x192xi32>
    %32 = arith.cmpi sge, %29, %31 : vector<1x192xi32>
    %33 = vector.extract_strided_slice %11 {offsets = [0, 0], sizes = [8, 191], strides = [1, 1]} : vector<8x192xf32> to vector<8x191xf32>
    %34 = tpu.concatenate %30, %33 in 1 : vector<8x1xf32>, vector<8x191xf32> -> vector<8x192xf32>
    %c0_i32_16 = arith.constant 0 : i32
    %35 = arith.sitofp %c0_i32_16 : i32 to f32
    %36 = vector.shape_cast %32 : vector<1x192xi1> to vector<1x192xi1>
    %37 = vector.broadcast %36 : vector<1x192xi1> to vector<8x192xi1>
    %38 = vector.broadcast %35 : f32 to vector<8x192xf32>
    %39 = arith.select %37, %34, %38 : vector<8x192xi1>, vector<8x192xf32>
    %c14_i32 = arith.constant 14 : i32
    %40 = vector.broadcast %c14_i32 : i32 to vector<1x192xi32>
    %41 = arith.cmpi sle, %29, %40 : vector<1x192xi32>
    %42 = vector.extract_strided_slice %11 {offsets = [0, 1], sizes = [8, 191], strides = [1, 1]} : vector<8x192xf32> to vector<8x191xf32>
    %43 = tpu.concatenate %42, %30 in 1 : vector<8x191xf32>, vector<8x1xf32> -> vector<8x192xf32>
    %c0_i32_17 = arith.constant 0 : i32
    %44 = arith.sitofp %c0_i32_17 : i32 to f32
    %45 = vector.shape_cast %41 : vector<1x192xi1> to vector<1x192xi1>
    %46 = vector.broadcast %45 : vector<1x192xi1> to vector<8x192xi1>
    %47 = vector.broadcast %44 : f32 to vector<8x192xf32>
    %48 = arith.select %46, %43, %47 : vector<8x192xi1>, vector<8x192xf32>
    %49 = vector.extract_strided_slice %39 {offsets = [0, 0], sizes = [8, 160], strides = [1, 1]} : vector<8x192xf32> to vector<8x160xf32>
    %50 = vector.extract_strided_slice %11 {offsets = [0, 0], sizes = [8, 160], strides = [1, 1]} : vector<8x192xf32> to vector<8x160xf32>
    %51 = vector.extract_strided_slice %48 {offsets = [0, 0], sizes = [8, 160], strides = [1, 1]} : vector<8x192xf32> to vector<8x160xf32>
    %52 = vector.extract_strided_slice %39 {offsets = [0, 16], sizes = [8, 160], strides = [1, 1]} : vector<8x192xf32> to vector<8x160xf32>
    %53 = vector.extract_strided_slice %11 {offsets = [0, 16], sizes = [8, 160], strides = [1, 1]} : vector<8x192xf32> to vector<8x160xf32>
    %54 = vector.extract_strided_slice %48 {offsets = [0, 16], sizes = [8, 160], strides = [1, 1]} : vector<8x192xf32> to vector<8x160xf32>
    %55 = vector.extract_strided_slice %39 {offsets = [0, 32], sizes = [8, 160], strides = [1, 1]} : vector<8x192xf32> to vector<8x160xf32>
    %56 = vector.extract_strided_slice %11 {offsets = [0, 32], sizes = [8, 160], strides = [1, 1]} : vector<8x192xf32> to vector<8x160xf32>
    %57 = vector.extract_strided_slice %48 {offsets = [0, 32], sizes = [8, 160], strides = [1, 1]} : vector<8x192xf32> to vector<8x160xf32>
    %58 = tpu.concatenate %49, %50, %51, %52, %53, %54, %55, %56, %57 in 0 : vector<8x160xf32>, vector<8x160xf32>, vector<8x160xf32>, vector<8x160xf32>, vector<8x160xf32>, vector<8x160xf32>, vector<8x160xf32>, vector<8x160xf32>, vector<8x160xf32> -> vector<72x160xf32>
    %cst_18 = arith.constant dense<0.000000e+00> : vector<4x160xf32>
    %59 = tpu.matmul %12, %58, %cst_18 {dimension_numbers = #tpu.dot_dimension_numbers<[1], [0], [0], [1], [0, 0, 1, 1], [], []>} : vector<4x72xf32>, vector<72x160xf32>, vector<4x160xf32> -> vector<4x160xf32>
    %c0_19 = arith.constant 0 : index
    %c0_20 = arith.constant 0 : index
    %60 = vector.load %arg6[%c0_19, %c0_20] : memref<4x1xf32, #tpu.memory_space<vmem>>, vector<4x1xf32>
    %61 = vector.broadcast %60 : vector<4x1xf32> to vector<4x160xf32>
    %62 = arith.mulf %59, %61 : vector<4x160xf32>
    %c0_21 = arith.constant 0 : index
    %c0_22 = arith.constant 0 : index
    %63 = vector.load %arg7[%c0_21, %c0_22] : memref<4x1xf32, #tpu.memory_space<vmem>>, vector<4x1xf32>
    %64 = vector.broadcast %63 : vector<4x1xf32> to vector<4x160xf32>
    %65 = arith.addf %62, %64 : vector<4x160xf32>
    %cst_23 = arith.constant 0.000000e+00 : f32
    %66 = vector.broadcast %cst_23 : f32 to vector<4x160xf32>
    %67 = arith.maximumf %65, %66 : vector<4x160xf32>
    %68 = tpu.iota {dimensions = array<i32: 1>} : vector<1x160xi32>
    %c0_i32_24 = arith.constant 0 : i32
    %69 = arith.cmpi sgt, %arg1, %c0_i32_24 : i32
    %c16_i32_25 = arith.constant 16 : i32
    %70 = vector.broadcast %c16_i32_25 : i32 to vector<1x160xi32>
    %71 = arith.cmpi sge, %68, %70 : vector<1x160xi32>
    %72 = vector.broadcast %69 : i1 to vector<1x160xi1>
    %73 = arith.ori %72, %71 : vector<1x160xi1>
    %c1_i32_26 = arith.constant 1 : i32
    %74 = arith.cmpi slt, %arg1, %c1_i32_26 : i32
    %c144_i32 = arith.constant 144 : i32
    %75 = vector.broadcast %c144_i32 : i32 to vector<1x160xi32>
    %76 = arith.cmpi slt, %68, %75 : vector<1x160xi32>
    %77 = vector.broadcast %74 : i1 to vector<1x160xi1>
    %78 = arith.ori %77, %76 : vector<1x160xi1>
    %79 = arith.andi %73, %78 : vector<1x160xi1>
    %cst_27 = arith.constant 0.000000e+00 : f32
    %80 = vector.shape_cast %79 : vector<1x160xi1> to vector<1x160xi1>
    %81 = vector.broadcast %80 : vector<1x160xi1> to vector<4x160xi1>
    %82 = vector.broadcast %cst_27 : f32 to vector<4x160xf32>
    %83 = arith.select %81, %67, %82 : vector<4x160xi1>, vector<4x160xf32>
    %c0_28 = arith.constant 0 : index
    %c0_29 = arith.constant 0 : index
    %84 = vector.load %arg8[%c0_28, %c0_29] : memref<4x36xf32, #tpu.memory_space<vmem>>, vector<4x36xf32>
    %85 = tpu.iota {dimensions = array<i32: 1>} : vector<1x160xi32>
    %c16_i32_30 = arith.constant 16 : i32
    %c0_i32_31 = arith.constant 0 : i32
    %86 = arith.cmpi eq, %c16_i32_30, %c0_i32_31 : i32
    %c1_i32_32 = arith.constant 1 : i32
    %87 = arith.select %86, %c1_i32_32, %c16_i32_30 : i32
    %88 = vector.broadcast %87 : i32 to vector<1x160xi32>
    %89 = arith.remsi %85, %88 : vector<1x160xi32>
    %c0_i32_33 = arith.constant 0 : i32
    %90 = vector.broadcast %c0_i32_33 : i32 to vector<1x160xi32>
    %91 = arith.cmpi ne, %89, %90 : vector<1x160xi32>
    %c0_i32_34 = arith.constant 0 : i32
    %92 = vector.broadcast %c0_i32_34 : i32 to vector<1x160xi32>
    %93 = arith.cmpi slt, %89, %92 : vector<1x160xi32>
    %c0_i32_35 = arith.constant 0 : i32
    %94 = arith.cmpi slt, %87, %c0_i32_35 : i32
    %95 = vector.broadcast %94 : i1 to vector<1x160xi1>
    %96 = vector.broadcast %95 : vector<1x160xi1> to vector<1x160xi1>
    %97 = arith.xori %93, %96 : vector<1x160xi1>
    %98 = arith.andi %97, %91 : vector<1x160xi1>
    %99 = vector.broadcast %87 : i32 to vector<1x160xi32>
    %100 = arith.addi %89, %99 : vector<1x160xi32>
    %101 = arith.select %98, %100, %89 : vector<1x160xi1>, vector<1x160xi32>
    %cst_36 = arith.constant 0.000000e+00 : f32
    %102 = vector.broadcast %cst_36 : f32 to vector<4x1xf32>
    %c1_i32_37 = arith.constant 1 : i32
    %103 = vector.broadcast %c1_i32_37 : i32 to vector<1x160xi32>
    %104 = arith.cmpi sge, %101, %103 : vector<1x160xi32>
    %105 = vector.extract_strided_slice %83 {offsets = [0, 0], sizes = [4, 159], strides = [1, 1]} : vector<4x160xf32> to vector<4x159xf32>
    %106 = tpu.concatenate %102, %105 in 1 : vector<4x1xf32>, vector<4x159xf32> -> vector<4x160xf32>
    %c0_i32_38 = arith.constant 0 : i32
    %107 = arith.sitofp %c0_i32_38 : i32 to f32
    %108 = vector.shape_cast %104 : vector<1x160xi1> to vector<1x160xi1>
    %109 = vector.broadcast %108 : vector<1x160xi1> to vector<4x160xi1>
    %110 = vector.broadcast %107 : f32 to vector<4x160xf32>
    %111 = arith.select %109, %106, %110 : vector<4x160xi1>, vector<4x160xf32>
    %c14_i32_39 = arith.constant 14 : i32
    %112 = vector.broadcast %c14_i32_39 : i32 to vector<1x160xi32>
    %113 = arith.cmpi sle, %101, %112 : vector<1x160xi32>
    %114 = vector.extract_strided_slice %83 {offsets = [0, 1], sizes = [4, 159], strides = [1, 1]} : vector<4x160xf32> to vector<4x159xf32>
    %115 = tpu.concatenate %114, %102 in 1 : vector<4x159xf32>, vector<4x1xf32> -> vector<4x160xf32>
    %c0_i32_40 = arith.constant 0 : i32
    %116 = arith.sitofp %c0_i32_40 : i32 to f32
    %117 = vector.shape_cast %113 : vector<1x160xi1> to vector<1x160xi1>
    %118 = vector.broadcast %117 : vector<1x160xi1> to vector<4x160xi1>
    %119 = vector.broadcast %116 : f32 to vector<4x160xf32>
    %120 = arith.select %118, %115, %119 : vector<4x160xi1>, vector<4x160xf32>
    %121 = vector.extract_strided_slice %111 {offsets = [0, 0], sizes = [4, 128], strides = [1, 1]} : vector<4x160xf32> to vector<4x128xf32>
    %122 = vector.extract_strided_slice %83 {offsets = [0, 0], sizes = [4, 128], strides = [1, 1]} : vector<4x160xf32> to vector<4x128xf32>
    %123 = vector.extract_strided_slice %120 {offsets = [0, 0], sizes = [4, 128], strides = [1, 1]} : vector<4x160xf32> to vector<4x128xf32>
    %124 = vector.extract_strided_slice %111 {offsets = [0, 16], sizes = [4, 128], strides = [1, 1]} : vector<4x160xf32> to vector<4x128xf32>
    %125 = vector.extract_strided_slice %83 {offsets = [0, 16], sizes = [4, 128], strides = [1, 1]} : vector<4x160xf32> to vector<4x128xf32>
    %126 = vector.extract_strided_slice %120 {offsets = [0, 16], sizes = [4, 128], strides = [1, 1]} : vector<4x160xf32> to vector<4x128xf32>
    %127 = vector.extract_strided_slice %111 {offsets = [0, 32], sizes = [4, 128], strides = [1, 1]} : vector<4x160xf32> to vector<4x128xf32>
    %128 = vector.extract_strided_slice %83 {offsets = [0, 32], sizes = [4, 128], strides = [1, 1]} : vector<4x160xf32> to vector<4x128xf32>
    %129 = vector.extract_strided_slice %120 {offsets = [0, 32], sizes = [4, 128], strides = [1, 1]} : vector<4x160xf32> to vector<4x128xf32>
    %130 = tpu.concatenate %121, %122, %123, %124, %125, %126, %127, %128, %129 in 0 : vector<4x128xf32>, vector<4x128xf32>, vector<4x128xf32>, vector<4x128xf32>, vector<4x128xf32>, vector<4x128xf32>, vector<4x128xf32>, vector<4x128xf32>, vector<4x128xf32> -> vector<36x128xf32>
    %cst_41 = arith.constant dense<0.000000e+00> : vector<4x128xf32>
    %131 = tpu.matmul %84, %130, %cst_41 {dimension_numbers = #tpu.dot_dimension_numbers<[1], [0], [0], [1], [0, 0, 1, 1], [], []>} : vector<4x36xf32>, vector<36x128xf32>, vector<4x128xf32> -> vector<4x128xf32>
    %c0_42 = arith.constant 0 : index
    %c0_43 = arith.constant 0 : index
    %132 = vector.load %arg9[%c0_42, %c0_43] : memref<4x1xf32, #tpu.memory_space<vmem>>, vector<4x1xf32>
    %133 = vector.broadcast %132 : vector<4x1xf32> to vector<4x128xf32>
    %134 = arith.mulf %131, %133 : vector<4x128xf32>
    %c0_44 = arith.constant 0 : index
    %c0_45 = arith.constant 0 : index
    %135 = vector.load %arg10[%c0_44, %c0_45] : memref<4x1xf32, #tpu.memory_space<vmem>>, vector<4x1xf32>
    %136 = vector.broadcast %135 : vector<4x1xf32> to vector<4x128xf32>
    %137 = arith.addf %134, %136 : vector<4x128xf32>
    %cst_46 = arith.constant 0.000000e+00 : f32
    %138 = vector.broadcast %cst_46 : f32 to vector<4x128xf32>
    %139 = arith.maximumf %137, %138 : vector<4x128xf32>
    %c0_47 = arith.constant 0 : index
    %c0_48 = arith.constant 0 : index
    %c0_49 = arith.constant 0 : index
    %140 = vector.load %arg11[%c0_47, %c0_48, %c0_49] : memref<1x4x128xf32, #tpu.memory_space<vmem>>, vector<1x4x128xf32>
    %141 = vector.shape_cast %140 : vector<1x4x128xf32> to vector<4x128xf32>
    %142 = vector.shape_cast %139 : vector<4x128xf32> to vector<1x4x128xf32>
    tpu.vector_store %arg11[%c0_47, %c0_48, %c0_49], %142 {strides = array<i32>} : memref<1x4x128xf32, #tpu.memory_space<vmem>>, vector<1x4x128xf32>,
    return
  }
  func.func @transform_0(%arg0: i32, %arg1: i32) -> (i32, i32, i32) {
    %c1_i32 = arith.constant 1 : i32
    %0 = arith.subi %arg1, %c1_i32 : i32
    %c0_i32 = arith.constant 0 : i32
    %1 = arith.maxsi %0, %c0_i32 : i32
    %c0_i32_0 = arith.constant 0 : i32
    %c0_i32_1 = arith.constant 0 : i32
    return %arg0, %c0_i32_0, %1 : i32, i32, i32
  }
  func.func @transform_1(%arg0: i32, %arg1: i32) -> (i32, i32, i32) {
    %c0_i32 = arith.constant 0 : i32
    %c0_i32_0 = arith.constant 0 : i32
    return %arg0, %c0_i32, %arg1 : i32, i32, i32
  }
  func.func @transform_2(%arg0: i32, %arg1: i32) -> (i32, i32, i32) {
    %c1_i32 = arith.constant 1 : i32
    %0 = arith.addi %arg1, %c1_i32 : i32
    %c1_i32_0 = arith.constant 1 : i32
    %1 = arith.minsi %0, %c1_i32_0 : i32
    %c0_i32 = arith.constant 0 : i32
    %c0_i32_1 = arith.constant 0 : i32
    return %arg0, %c0_i32, %1 : i32, i32, i32
  }
  func.func @transform_3(%arg0: i32, %arg1: i32) -> (i32, i32) {
    %c0_i32 = arith.constant 0 : i32
    %c0_i32_0 = arith.constant 0 : i32
    %c0_i32_1 = arith.constant 0 : i32
    return %c0_i32, %c0_i32_0 : i32, i32
  }
  func.func @transform_4(%arg0: i32, %arg1: i32) -> (i32, i32) {
    %c0_i32 = arith.constant 0 : i32
    %c0_i32_0 = arith.constant 0 : i32
    %c0_i32_1 = arith.constant 0 : i32
    return %c0_i32, %c0_i32_0 : i32, i32
  }
  func.func @transform_5(%arg0: i32, %arg1: i32) -> (i32, i32) {
    %c0_i32 = arith.constant 0 : i32
    %c0_i32_0 = arith.constant 0 : i32
    %c0_i32_1 = arith.constant 0 : i32
    return %c0_i32, %c0_i32_0 : i32, i32
  }
  func.func @transform_6(%arg0: i32, %arg1: i32) -> (i32, i32) {
    %c0_i32 = arith.constant 0 : i32
    %c0_i32_0 = arith.constant 0 : i32
    %c0_i32_1 = arith.constant 0 : i32
    return %c0_i32, %c0_i32_0 : i32, i32
  }
  func.func @transform_7(%arg0: i32, %arg1: i32) -> (i32, i32) {
    %c0_i32 = arith.constant 0 : i32
    %c0_i32_0 = arith.constant 0 : i32
    %c0_i32_1 = arith.constant 0 : i32
    return %c0_i32, %c0_i32_0 : i32, i32
  }
  func.func @transform_8(%arg0: i32, %arg1: i32) -> (i32, i32) {
    %c0_i32 = arith.constant 0 : i32
    %c0_i32_0 = arith.constant 0 : i32
    %c0_i32_1 = arith.constant 0 : i32
    return %c0_i32, %c0_i32_0 : i32, i32
  }
  func.func @transform_9(%arg0: i32, %arg1: i32) -> (i32, i32, i32) {
    %c0_i32 = arith.constant 0 : i32
    %c0_i32_0 = arith.constant 0 : i32
    return %arg0, %c0_i32, %arg1 : i32, i32, i32
  }
}

</mosaic_0001>

<bundles_post_ra>
// kernel: tpu_custom_call.1
= control target key start
LH: loop header
LB: loop body
LE: loop exit
PB: predicated region body
PF: predicated region fallthrough
CT: control target
= control target key end

     0   :  { %s2187_s0 = inlined_call_operand.hbm [shape: f32[2,8,256], index: 0, kind: input, shape index: {}]   ;;  %s2188_s1 = inlined_call_operand.hbm [shape: f32[2,8,256], index: 1, kind: input, shape index: {}]   ;;  %s2189_s2 = inlined_call_operand.hbm [shape: f32[2,8,256], index: 2, kind: input, shape index: {}]   ;;  %s2190_s3 = inlined_call_operand.vmem [shape: f32[4,72], index: 3, kind: input, shape index: {}]   ;;  %s2191_s4 = inlined_call_operand.vmem [shape: f32[4,1], index: 4, kind: input, shape index: {}]   ;;  %s2192_s5 = inlined_call_operand.vmem [shape: f32[4,1], index: 5, kind: input, shape index: {}]   ;;  %s2193_s6 = inlined_call_operand.vmem [shape: f32[4,36], index: 6, kind: input, shape index: {}]   ;;  %s2194_s7 = inlined_call_operand.vmem [shape: f32[4,1], index: 7, kind: input, shape index: {}]   ;;  %s2195_s8 = inlined_call_operand.vmem [shape: f32[4,1], index: 8, kind: input, shape index: {}]   ;;  %s2196_s9 = inlined_call_operand.hbm [shape: f32[2,4,256], index: 9, kind: output, shape index: {}]  }
   0x1   :  { %2214 = sst [smem:[#allocation21_spill]] %s2188_s1 }
   0x2   :  { %2215 = sst [smem:[#allocation22_spill]] %s2190_s3 }
   0x3   :  { %2216 = sst [smem:[#allocation23_spill]] %s2191_s4 }
   0x4   :  { %2217 = sst [smem:[#allocation24_spill]] %s2192_s5 }
   0x5   :  { %2218 = sst [smem:[#allocation25_spill]] %s2193_s6 }
   0x6   :  { %2219 = sst [smem:[#allocation26_spill]] %s2194_s7 }
   0x7   :  { %2220 = sst [smem:[#allocation27_spill]] %s2195_s8 }
   0x8   :  { %2221 = sst [smem:[#allocation28_spill]] %s2196_s9 }
   0x9   :  { %14 = vsyncpa [#allocation3], 0 }
   0xa   :  { %16 = vsyncpa [#allocation3 + $0x1], 0 }
   0xb   :  { %17 = vsyncpa [#allocation6], 0 }
   0xc   :  { %19 = vsyncpa [#allocation6 + $0x1], 0 }
   0xd   :  { %20 = vsyncpa [#allocation4], 0 }
   0xe   :  { %22 = vsyncpa [#allocation4 + $0x1], 0  ;;  %s1648_s30 = smov 0   ;;  %s1650_s10 = smov 0  }
   0xf   :  { %s1652_s11 = smov 0   ;;  %s1654_s12 = smov 0  }
  0x10   :  { %s1656_s13 = smov 0   ;;  %s1658_s14 = smov 0  }
  0x11   :  { %s1660_s15 = smov 0   ;;  %s1662_s16 = smov 0  }
  0x12   :  { %s1664_s17 = smov 0   ;;  %s1666_s18 = smov 0  }
  0x13   :  { %s1668_s19 = smov 0   ;;  %s1670_s20 = smov 0  }
  0x14   :  { %s1672_s21 = smov 0   ;;  %s1674_s22 = smov 0  }
  0x15 LB: > { %2222 = sst [smem:[#allocation13_spill]] %s1542_s12  ;;  %s1719_s23 = sadd.s32 4294967295, %s1582_s22   ;;  %s1582_s22 = sphi %s1674_s22, %s28_s22   ;;  %s1578_s21 = sphi %s1672_s21, %s2292_s21   ;;  %s1574_s20 = sphi %s1670_s20, %s2280_s20   ;;  %s1570_s19 = sphi %s1668_s19, %s2291_s19   ;;  %s1566_s18 = sphi %s1666_s18, %s2279_s18   ;;  %s1562_s17 = sphi %s1664_s17, %s2290_s17   ;;  %s1558_s16 = sphi %s1662_s16, %s2289_s16   ;;  %s1554_s15 = sphi %s1660_s15, %s2288_s15   ;;  %s1550_s14 = sphi %s1658_s14, %s2287_s14   ;;  %s1546_s13 = sphi %s1656_s13, %s2286_s13   ;;  %s1542_s12 = sphi %s1654_s12, %s2285_s12   ;;  %s1538_s11 = sphi %s1652_s11, %s2284_s11   ;;  %s1534_s10 = sphi %s1650_s10, %s2283_s10   ;;  %s1530_s30 = sphi %s1648_s30, %s2282_s30  }
  0x16   : > { %2223 = sst [smem:[#allocation14_spill]] %s1566_s18  ;;  %s1043_s24 = sadd.s32 4294967294, %s1582_s22  }
  0x17   : > { %2224 = sst [smem:[#allocation15_spill]] %s1570_s19  ;;  %s37_s25 = sadd.s32 1, %s1574_s20 }
  0x18   : > { %2225 = sst [smem:[#allocation16_spill]] %s1574_s20  ;;  %s40_s26 = sadd.s32 1, %s1578_s21 }
  0x19   : > { %p38_p0 = scmp.ge.s32.totalorder %s37_s25, 2  ;;  %p2205_p1 = scmp.eq.s32.totalorder %s1582_s22, 0 }
  0x1a   : > { %p2204_p2 = scmp.eq.s32.totalorder %s1719_s23, 0  ;;  %p90_p3 = scmp.ne.s32.totalorder %s1550_s14, %s1546_s13 }
  0x1b   : > { %s2294_s25 = smov (%p38_p0, %s37_s25), 0  ;;  %s2296_s26 = smov (!%p38_p0, %s40_s26), %s1578_s21 }
  0x1c   : > { %2226 = sst [smem:[#allocation17_spill]] %s2294_s25  ;;  %p96_p4 = scmp.ne.s32.totalorder %s1546_s13, %s1542_s12 }
  0x1d   : > { %p282_p5 = scmp.eq.s32.totalorder %s1719_s23, 3  ;;  %p1741_p6 = por %p90_p3, %p2205_p1 }
  0x1e   : > { %p288_p7 = scmp.eq.s32.totalorder %s1043_s24, 3  ;;  %p1747_p8 = por %p96_p4, %p2204_p2 }
  0x1f   : > { %p1751_p9 = por %p282_p5, %p90_p3  ;;  %p2203_p11 = scmp.lt.s32.totalorder %s1582_s22, 4 }
  0x20   : > { %s2228_s27 = scalar_select %p1747_p8, 1, 0 }
  0x21   : > { %s2230_s28 = scalar_select %p1751_p9, 1, 0 }
  0x22   : > { %2229 = sst [smem:[#allocation18_spill]] %s2228_s27  ;;  %p1755_p10 = por %p288_p7, %p96_p4 }
  0x23   : > { %s1050_s9 = sshll.u32 %s1578_s21, 1  ;;  %s349_s6 = sand.u32 1, %s1582_s22  }
  0x24   : > { %s2231_s12 = scalar_select %p1755_p10, 1, 0 }
  0x25   : > { %s351_s19 = sand.u32 1, %s1550_s14   ;;  %s358_s8 = sadd.s32 %s1574_s20, %s1050_s9 }
  0x26   : > { %2232 = sst [smem:[#allocation19_spill]] %s2231_s12  ;;  %s1052_s24 = sshll.u32 %s351_s19, 3 }
  0x27   : > { %s1054_s7 = sshll.u32 %s358_s8, 7  ;;  %s353_s3 = scalar_lea.vmem [#allocation5], %s1052_s24 }
  0x28   : > { %s362_s5 = sshll.u32 %s353_s3, 4  ;;  %s2233_s1 = sld [smem:[#allocation21_spill]]  ;;  %s1769_s5 = int_to_ptr.vmem [resolvable:$true] %s362_s5 }
  0x29   : > { %p1775_p12 = pnand %p2203_p11, %p1741_p6  ;;  %s1781_s3 = scalar_lea.sflag [#allocation6], %s349_s6 }
  0x2b   : > { %p1336_p4 = pneg %p1775_p12 }
  0x2e   : > { %s1767_s27 = scalar_lea.hbm %s2233_s1, %s1054_s7  ;;  %s1339_s9 = scalar_lea.hbm %s2233_s1, 512 }
  0x2f   : > { %s1334_s4 = scalar_lea.hbm %s1767_s27, 128  ;;  %p1340_p6 = scmp.lt.u32.totalorder %s1767_s27, %s2233_s1 }
  0x30   : > { %p1335_p3 = scmp.ne.s32.totalorder %s1767_s27, %s1334_s4  ;;  %p1341_p11 = scmp.lt.u32.totalorder %s1339_s9, %s1334_s4 }
  0x31   : > { %p1343_p1 = scmp.lt.u32.totalorder %s1334_s4, %s1767_s27 }
  0x32   : > { %p1337_p5 = pnand %p1336_p4, %p1335_p3  ;;  %p1342_p2 = por %p1341_p11, %p1340_p6 }
  0x34   : > { %p1338_p7 = pneg %p1337_p5  ;;  %p1344_p13 = por %p1343_p1, %p1342_p2 }
  0x36   : > { %p1345_p0 = pnand %p1344_p13, %p1338_p7 }
  0x38   : > { %1348 = shalt.err (!%p1345_p0)
}
  0x39   : > { %s1349_s6 = scalar_lea.vmem %s1769_s5, 128  ;;  %s1584_s29 = smov [#allocation5]  }
  0x3a   : > { %p1350_p3 = scmp.ne.s32.totalorder %s1769_s5, %s1349_s6  ;;  %s1354_s24 = sshll.u32 %s1584_s29, 4  ;;  %s1355_s24 = int_to_ptr.vmem [resolvable:$false] %s1354_s24 }
  0x3b   : > { %s1356_s7 = scalar_lea.vmem %s1355_s24, 256  ;;  %p1357_p9 = scmp.lt.s32.totalorder %s1769_s5, %s1355_s24 }
  0x3c   : > { %p1352_p5 = pnand %p1350_p3, %p1336_p4  ;;  %p1358_p11 = scmp.lt.s32.totalorder %s1356_s7, %s1349_s6 }
  0x3e   : > { %p1353_p10 = pneg %p1352_p5  ;;  %p1359_p6 = por %p1358_p11, %p1357_p9 }
  0x40   : > { %p1360_p1 = pnand %p1359_p6, %p1353_p10 }
  0x42   : > { %1363 = shalt.err (!%p1360_p1)
}
  0x43   : > { %1134 = dma.hbm_to_vmem [thread:$0]  (!%p1775_p12), %s1767_s27, 128, %s1769_s5, %s1781_s3  }
  0x44   : > { %p2235_p2 = scmp.lt.s32.totalorder %s1582_s22, 5  ;;  %p2236_p9 = scmp.ge.s32.totalorder %s1582_s22, 1 }
  0x45   : > { %p42_p13 = scmp.ge.s32.totalorder %s2296_s26, 2  ;;  %s55_s8 = sadd.s32 1, %s1562_s17 }
  0x46   : > { %p1813_p10 = pnand %p2236_p9, %p2235_p2  ;;  %p62_p0 = scmp.ne.s32.totalorder %s1562_s17, %s1558_s16 }
  0x47   : > { %s2298_s26 = smov (%p42_p13, %s2296_s26), 0  ;;  %p68_p12 = scmp.ne.s32.totalorder %s1558_s16, %s1554_s15 }
  0x48   : > { %2238 = sst [smem:[#allocation20_spill]] %s2298_s26  ;;  %s1823_s4 = ssub.s32 %s1578_s21, %s2298_s26 }
  0x49   : > { %s2239_s5 = ssub.s32 %s1574_s20, %s2294_s25  ;;  %p2240_p4 = scmp.eq.s32.totalorder %s1582_s22, 0 }
  0x4a   : > { %s80_s27 = sor.u32 %s2239_s5, %s1823_s4  ;;  %p2210_p3 = scmp.eq.s32.totalorder %s1823_s4, 0 }
  0x4b   : > { %p1836_p7 = por %p2240_p4, %p62_p0  ;;  %p2242_p5 = scmp.eq.s32.totalorder %s1719_s23, 0 }
  0x4c   : > { %p81_p6 = scmp.eq.s32.totalorder %s80_s27, 0  ;;  %s326_s19 = sand.u32 1, %s1562_s17  }
  0x4d   : > { %p1843_p11 = por %p2242_p5, %p68_p12  ;;  %s2244_s15 = sadd.s32 1, %s1550_s14 }
  0x4e   : > { %s1851_s6 = scalar_select %p2210_p3, %s1562_s17, %s55_s8  }
  0x4f   : > { %s2243_s18 = scalar_select %p1843_p11, 1, 0 }
  0x50   : > { %s1856_s29 = scalar_select %p81_p6, %s1550_s14, %s2244_s15  }
  0x51   : > { %s1048_s24 = sshll.u32 %s326_s19, 3  ;;  %s1524_s7 = sshll.u32 %s1578_s21, 8 }
  0x52   : > { %s330_s5 = scalar_lea.vmem [#allocation2], %s1048_s24  ;;  %s1864_s20 = scalar_lea.hbm %s2187_s0, %s1524_s7 }
  0x53   : > { %s342_s1 = sshll.u32 %s330_s5, 4  ;;  %p2245_p1 = scmp.lt.s32.totalorder %s1582_s22, 4  ;;  %s1866_s1 = int_to_ptr.vmem [resolvable:$true] %s342_s1 }
  0x54   : > { %s327_s27 = scalar_lea.sflag [#allocation3], %s326_s19  ;;  %s1364_s15 = scalar_lea.hbm %s1864_s20, 128 }
  0x55   : > { %p1872_p2 = pnand %p2245_p1, %p1836_p7  ;;  %p1365_p9 = scmp.ne.s32.totalorder %s1864_s20, %s1364_s15 }
  0x56   : > { %s1369_s9 = scalar_lea.hbm %s2187_s0, 512  ;;  %p1370_p4 = scmp.lt.u32.totalorder %s1864_s20, %s2187_s0 }
  0x57   : > { %p1366_p13 = pneg %p1872_p2  ;;  %p1371_p7 = scmp.lt.u32.totalorder %s1369_s9, %s1364_s15 }
  0x58   : > { %p1373_p6 = scmp.lt.u32.totalorder %s1364_s15, %s1864_s20 }
  0x59   : > { %p1367_p0 = pnand %p1366_p13, %p1365_p9  ;;  %p1372_p5 = por %p1371_p7, %p1370_p4 }
  0x5b   : > { %p1368_p12 = pneg %p1367_p0  ;;  %p1374_p1 = por %p1373_p6, %p1372_p5 }
  0x5d   : > { %p1375_p3 = pnand %p1374_p1, %p1368_p12 }
  0x5f   : > { %1378 = shalt.err (!%p1375_p3)
}
  0x60   : > { %s1379_s19 = scalar_lea.vmem %s1866_s1, 128  ;;  %s1585_s25 = smov [#allocation2]  }
  0x61   : > { %p1380_p9 = scmp.ne.s32.totalorder %s1866_s1, %s1379_s19  ;;  %s1384_s26 = sshll.u32 %s1585_s25, 4  ;;  %s1385_s26 = int_to_ptr.vmem [resolvable:$false] %s1384_s26 }
  0x62   : > { %s1386_s24 = scalar_lea.vmem %s1385_s26, 256  ;;  %p1387_p11 = scmp.lt.s32.totalorder %s1866_s1, %s1385_s26 }
  0x63   : > { %p1382_p0 = pnand %p1380_p9, %p1366_p13  ;;  %p1388_p4 = scmp.lt.s32.totalorder %s1386_s24, %s1379_s19 }
  0x65   : > { %p1383_p8 = pneg %p1382_p0  ;;  %p1389_p7 = por %p1388_p4, %p1387_p11 }
  0x67   : > { %p1390_p5 = pnand %p1389_p7, %p1383_p8 }
  0x69   : > { %1393 = shalt.err (!%p1390_p5)
}
  0x6a   : > { %1131 = dma.hbm_to_vmem [thread:$0]  (!%p1872_p2), %s1864_s20, 128, %s1866_s1, %s327_s27  }
  0x6b   : > { %s117_s15 = sadd.s32 1, %s1538_s11  ;;  %p124_p8 = scmp.ne.s32.totalorder %s1538_s11, %s1534_s10 }
  0x6c   : > { %p130_p3 = scmp.ne.s32.totalorder %s1534_s10, %s1530_s30  ;;  %s371_s9 = sand.u32 1, %s1538_s11  }
  0x6d   : > { %p2247_p11 = scmp.eq.s32.totalorder %s1582_s22, 0  ;;  %p2248_p12 = scmp.eq.s32.totalorder %s1719_s23, 0 }
  0x6e   : > { %s1055_s5 = sshll.u32 %s371_s9, 3  ;;  %p2250_p1 = scmp.eq.s32.totalorder %s1823_s4, 0 }
  0x6f   : > { %p126_p13 = por %p124_p8, %p2247_p11  ;;  %p1911_p6 = por %p130_p3, %p2248_p12 }
  0x70   : > { %s1918_s19 = scalar_select %p2250_p1, %s1538_s11, %s117_s15  }
  0x71   : > { %s2249_s8 = scalar_select %p1911_p6, 1, 0 }
  0x72   : > { %s1526_s25 = sadd.s32 128, %s1524_s7  ;;  %s373_s30 = scalar_lea.vmem [#allocation7], %s1055_s5 }
  0x73   : > { %s1925_s1 = scalar_lea.hbm %s2189_s2, %s1526_s25  ;;  %s385_s20 = sshll.u32 %s373_s30, 4  ;;  %s1927_s20 = int_to_ptr.vmem [resolvable:$true] %s385_s20 }
  0x74   : > { %p2251_p2 = scmp.lt.s32.totalorder %s1582_s22, 4  ;;  %s1394_s7 = scalar_lea.hbm %s1925_s1, 128 }
  0x75   : > { %p1395_p0 = scmp.ne.s32.totalorder %s1925_s1, %s1394_s7  ;;  %s1399_s9 = scalar_lea.hbm %s2189_s2, 512 }
  0x76   : > { %p1931_p9 = pnand %p2251_p2, %p126_p13  ;;  %p1400_p8 = scmp.lt.u32.totalorder %s1925_s1, %s2189_s2 }
  0x77   : > { %p1401_p3 = scmp.lt.u32.totalorder %s1399_s9, %s1394_s7  ;;  %p1403_p13 = scmp.lt.u32.totalorder %s1394_s7, %s1925_s1 }
  0x78   : > { %p1396_p4 = pneg %p1931_p9 }
  0x79   : > { %p1402_p11 = por %p1401_p3, %p1400_p8 }
  0x7a   : > { %p1397_p7 = pnand %p1396_p4, %p1395_p0 }
  0x7b   : > { %p1404_p12 = por %p1403_p13, %p1402_p11 }
  0x7c   : > { %p1398_p5 = pneg %p1397_p7 }
  0x7e   : > { %p1405_p1 = pnand %p1404_p12, %p1398_p5 }
  0x80   : > { %1408 = shalt.err (!%p1405_p1)
}
  0x81   : > { %s1409_s26 = scalar_lea.vmem %s1927_s20, 128  ;;  %s1586_s24 = smov [#allocation7]  }
  0x82   : > { %p1410_p2 = scmp.ne.s32.totalorder %s1927_s20, %s1409_s26  ;;  %s1414_s30 = sshll.u32 %s1586_s24, 4  ;;  %s1415_s30 = int_to_ptr.vmem [resolvable:$false] %s1414_s30 }
  0x83   : > { %s1416_s27 = scalar_lea.vmem %s1415_s30, 256  ;;  %p1417_p6 = scmp.lt.s32.totalorder %s1927_s20, %s1415_s30 }
  0x84   : > { %p1412_p0 = pnand %p1410_p2, %p1396_p4  ;;  %p1418_p8 = scmp.lt.s32.totalorder %s1416_s27, %s1409_s26 }
  0x86   : > { %p1413_p7 = pneg %p1412_p0  ;;  %p1419_p3 = por %p1418_p8, %p1417_p6 }
  0x88   : > { %p1420_p11 = pnand %p1419_p3, %p1413_p7 }
  0x8a   : > { %1423 = shalt.err (!%p1420_p11)
}
  0x8b   : > { %1137 = dma.hbm_to_vmem [thread:$0]  (!%p1931_p9), %s1925_s1, 128, %s1927_s20, %s1781_s3  }
  0x8c   : > { %394 = sbr.rel (%p1813_p10) target bundleno = 1260 (0x4ec), region = 56  ;;  %s396_s7 = sand.u32 (!%p1813_p10), 1, %s1558_s16  }
  0x8d   : > { %s1059_s15 = sshll.u32 (!%p1813_p10), %s396_s7, 3  ;;  %s397_s9 = scalar_lea.sflag (!%p1813_p10), [#allocation3], %s396_s7 }
  0x8e   : > { %s400_s5 = scalar_lea.vmem (!%p1813_p10), [#allocation2], %s1059_s15  ;;  %p2253_p4 = scmp.ne.s32.totalorder (!%p1813_p10), %s2243_s18, 0 }
  0x93   : > { %1509 = dma.done.wait (%p2253_p4), %s397_s9, 128  }
  0x94   : > { %1511 = vsyncadd (%p2253_p4), %s397_s9, 4294967168  ;;  %s2254_s4 = sld [smem:[#allocation18_spill]]  ;;  %s405_s25 = sand.u32 1, %s1719_s23  }
  0x95   : > { %s1970_s26 = sand.u32 1, %s1546_s13   ;;  %s406_s12 = scalar_lea.sflag [#allocation6], %s405_s25 }
  0x96   : > { %s1060_s3 = sshll.u32 %s1970_s26, 3 }
  0x97   : > { %s409_s1 = scalar_lea.vmem [#allocation5], %s1060_s3 }
  0x9a   : > { %p2255_p10 = scmp.ne.s32.totalorder %s2254_s4, 0 }
  0x9c   : > { %1513 = dma.done.wait (%p2255_p10), %s406_s12, 128  }
  0x9d   : > { %1515 = vsyncadd (%p2255_p10), %s406_s12, 4294967168  ;;  %s416_s20 = sand.u32 1, %s1534_s10   ;;  %p2256_p6 = scmp.ne.s32.totalorder %s2249_s8, 0 }
  0x9e   : > { %s1061_s18 = sshll.u32 %s416_s20, 3 }
  0x9f   : > { %s418_s24 = scalar_lea.vmem [#allocation7], %s1061_s18 }
  0xa0   : > { %1517 = dma.done.wait (%p2256_p6), %s406_s12, 128  }
  0xa1   : > { %1519 = vsyncadd (%p2256_p6), %s406_s12, 4294967168  ;;  %s2257_s23 = sld [smem:[#allocation14_spill]]  ;;  %s1587_s7 = smov 32   ;;  %v469_v2 = vld [vmem:[%s409_s1] sm:$0xff]  ;;  %vm494_vm0 = vcmask 261120   ;;  %v498_v9 = vlaneseq  ;;  %vm533_vm1 = vcmask 7168  }
  0xa2   : > { %s1588_s8 = smov 127   ;;  %s1589_s15 = smov 1   ;;  %vm550_vm4 = vcmask 1039360   ;;  %vm554_vm5 = vcmask 515072   ;;  %vm1591_vm7 = vmmov 1   ;;  %v1593_v35 = vmov 0.0  }
  0xa3   : > { %s1590_s9 = smov 112   ;;  %v1988_v10 = vand.u32 127, %v498_v9  ;;  %678 = vmatprep.mubr.f32.mxu0 %v1593_v35  ;;  %s2266_s3 = sld [smem:[#allocation23_spill]]  ;;  %v1594_v37 = vmov 0   ;;  %vm568_vm11 = vcmask 916480   ;;  %vm592_vm14 = vcmask 785408  }
  0xa4   : > { %1296 = vset.pattern.permute.xlu1 %v1594_v37  ;;  %1297 = vset.pattern.permute.xlu0 %v1594_v37  ;;  %s2267_s20 = sld [smem:[#allocation24_spill]]  ;;  %vm610_vm15 = vcmask 588800   ;;  %s2269_s4 = sld [smem:[#allocation26_spill]] }
  0xa5   : > { %v1991_v11 = vadd.s32 128, %v1988_v10  ;;  %v505_v13 = vand.u32 15, %v1988_v10  ;;  %s2270_s12 = sld [smem:[#allocation27_spill]]  ;;  %s1062_s18 = sshll.u32 %s1970_s26, 2 }
  0xa6   : > { %s2273_s25 = sld [smem:[#allocation28_spill]]  ;;  %p2274_p2 = scmp.ne.s32.totalorder %s2230_s28, 0 }
  0xa7   : > { %p472_p9 = scmp.eq.s32.totalorder %s2257_s23, 0  ;;  %p477_p5 = scmp.eq.s32.totalorder %s2257_s23, 1  ;;  %v512_v12 = vand.u32 15, %v1991_v11  ;;  %vm1999_vm3 = vcmp.ge.s32.totalorder %v505_v13, 1  ;;  %vm2012_vm9 = vcmp.le.s32.totalorder %v505_v13, 14 }
  0xa8   : > { %vm1098_vm10 = vmpackc.low %vm1591_vm7, %vm1999_vm3  ;;  %p703_p13 = scmp.gt.s32.totalorder %s2257_s23, 0  ;;  %p711_p12 = scmp.lt.s32.totalorder %s2257_s23, 1 }
  0xa9   : > { %s1329_s30 = scalar_select %p472_p9, 0, 255  ;;  %vm1995_vm2 = vcmp.ge.s32.totalorder %v512_v12, 1  ;;  %vm2004_vm6 = vcmp.le.s32.totalorder %v512_v12, 14  ;;  %v685_v36 = vld [vmem:[%s2266_s3] sm:$0xf]  ;;  %vm1104_vm13 = vmpackc.low %vm1591_vm7, %vm2012_vm9 }
  0xaa   : > { %s1332_s27 = scalar_select %p477_p5, 0, 255  ;;  %vm1095_vm8 = vmpackc.low %vm1591_vm7, %vm1995_vm2  ;;  %v693_v38 = vld [vmem:[%s2267_s20] sm:$0xf] }
  0xab   : > { %v1330_v0 = vld [vmem:[%s400_s5] sm:%s1329_s30]  ;;  %s1592_s5 = smov 96   ;;  %vm1101_vm12 = vmpackc.low %vm1591_vm7, %vm2004_vm6  ;;  %s2268_s30 = sld [smem:[#allocation22_spill]]  ;;  %vm713_vm7 = vcmp.lt.s32.totalorder %v1991_v11, 144 }
  0xac   : > { %483 = vrot.lane.b32.xlu0 %v1330_v0, %s1587_s7  ;;  %v1333_v1 = vld [vmem:[%s418_s24] sm:%s1332_s27]  ;;  %s706_s27 = scalar_select %p703_p13, 1, 0 }
  0xad   : > { %491 = vrot.lane.b32.xlu1 %v1333_v1, %s1587_s7  ;;  %s2272_s20 = sld [smem:[#allocation25_spill]] }
  0xb0   : > { %487 = vrot.lane.b32.xlu0 %v469_v2, %s1587_s7  ;;  %s714_s7 = scalar_select %p711_p12, 1, 0 }
 0x11e   : > { %v484_v3 = vpop.permute.xlu0 %483 }
 0x11f   : > { %v492_v4 = vpop.permute.xlu1 %491 }
 0x122   : > { %v488_v5 = vpop.permute.xlu0 %487 }
 0x123   : > { %v495_v6 = vsel %vm494_vm0, %v484_v3, %v488_v5  ;;  %v496_v7 = vsel %vm494_vm0, %v488_v5, %v492_v4  ;;  %v497_v3 = vld [vmem:[%s2268_s30] sm:$0xf]  ;;  %vm704_vm0 = vcmp.ge.s32.totalorder %v1988_v10, 16 }
 0x124   : > { %546 = vrot.lane.b32.xlu0 %v495_v6, %s1588_s8  ;;  %v1266_v8 = vpack.i.bf16 %v496_v7, %v495_v6 }
 0x126   : > { %1267 = vrot.lane.b32.xlu1 %v1266_v8, %s1589_s15 }
 0x12a   : > { %548 = vrot.lane.b32.xlu1 %v496_v7, %s1588_s8 }
 0x12e   : > { %1272 = vrot.lane.b32.xlu1 %v1266_v8, %s1590_s9 }
 0x196   : > { %v547_v23 = vpop.permute.xlu0 %546 }
 0x198   : > { %v1268_v14 = vpop.permute.xlu1 %1267 }
 0x199   : > { %v1270_v16 = vunpack.i.h.bf16 %v1268_v14  ;;  %v1269_v17 = vunpack.i.l.bf16 %v1268_v14 }
 0x19b   : > { %v537_v19 = vsel %vm533_vm1, 0.0, %v1269_v17  ;;  %v534_v21 = vsel %vm533_vm1, %v1269_v17, %v1270_v16 }
 0x19c   : > { %v549_v24 = vpop.permute.xlu1 %548  ;;  %v543_v25 = vsel %vm1995_vm2, %v534_v21, 0.0  ;;  %v1094_v26 = vpack.c.bf16 %v496_v7, %v534_v21  ;;  %v1097_v27 = vpack.c.bf16 %v495_v6, %v537_v19  ;;  %v542_v28 = vsel %vm1999_vm3, %v537_v19, 0.0 }
 0x19d   : > { %v551_v29 = vsel %vm550_vm4, %v547_v23, %v549_v24  ;;  %v555_v30 = vsel %vm554_vm5, %v549_v24, 0.0  ;;  %v1286_v31 = vpack.i.bf16 %v543_v25, %v542_v28  ;;  %v707_v6 = vstv %s706_s27 }
 0x19e   : > { %1096 = vmatprep.subr.msk.bf16.mxu0 %vm1095_vm8, %v1094_v26  ;;  %v561_v32 = vsel %vm2004_vm6, %v555_v30, 0.0  ;;  %v560_v33 = vsel %vm2012_vm9, %v551_v29, 0.0  ;;  %v715_v7 = vstv %s714_s7  ;;  %vm708_vm5 = vcmp.eq.s32.totalorder %v707_v6, 1  ;;  %s462_s7 = scalar_lea.vmem [#allocation8], %s1062_s18 }
 0x19f   : > { %1099 = vmatpush1.bf16.msk.msra.mxu0 %vm1098_vm10, %v1097_v27  ;;  %1287 = vrot.lane.b32.xlu1 %v1286_v31, %s1592_s5  ;;  %v1281_v34 = vpack.i.bf16 %v561_v32, %v560_v33  ;;  %vm716_vm8 = vcmp.eq.s32.totalorder %v715_v7, 1  ;;  %vm709_vm10 = vmor %vm708_vm5, %vm704_vm0  ;;  %v1595_v28 = vmov 0.0|0.0  }
 0x1a0   : > { %1277 = vrot.lane.b32.xlu0 %v1286_v31, %s1590_s9  ;;  %v1273_v39 = vpop.permute.xlu1 %1272  ;;  %1114 = vmatprep.subr.bf16.mxu1 %v1595_v28 }
 0x1a1   : > { %v1275_v43 = vunpack.i.h.bf16 %v1273_v39  ;;  %v1274_v44 = vunpack.i.l.bf16 %v1273_v39 }
 0x1a3   : > { %603 = vrot.lane.b32.xlu1 %v560_v33, %s1592_s5  ;;  %v576_v52 = vsel %vm568_vm11, %v1274_v44, %v1275_v43  ;;  %v878_v44 = vld [vmem:[%s2269_s4] sm:$0xf] }
 0x1a4   : > { %1282 = vrot.lane.b32.xlu0 %v1281_v34, %s1590_s9 }
 0x1a7   : > { %688 = vperm.xlu1 %1296, %v685_v36  }
 0x1a8   : > { %1292 = vrot.lane.b32.xlu0 %v1266_v8, %s1592_s5 }
 0x1ac   : > { %605 = vrot.lane.b32.xlu0 %v561_v32, %s1592_s5 }
 0x1b0   : > { %696 = vperm.xlu0 %1297, %v693_v38  }
 0x211   : > { %v1288_v47 = vpop.permute.xlu1 %1287 }
 0x212   : > { %v1278_v40 = vpop.permute.xlu0 %1277  ;;  %v1290_v53 = vunpack.i.h.bf16 %v1288_v47  ;;  %v1289_v54 = vunpack.i.l.bf16 %v1288_v47 }
 0x213   : > { %v1280_v41 = vunpack.i.h.bf16 %v1278_v40  ;;  %v1279_v42 = vunpack.i.l.bf16 %v1278_v40 }
 0x214   : > { %v593_v62 = vsel %vm592_vm14, %v1289_v54, %v1290_v53 }
 0x215   : > { %v1100_v45 = vpack.c.bf16 %v1280_v41, %v555_v30  ;;  %v569_v46 = vsel %vm568_vm11, %v1279_v42, %v1280_v41  ;;  %v604_v2 = vpop.permute.xlu1 %603 }
 0x216   : > { %v1103_v48 = vpack.c.bf16 %v569_v46, %v551_v29  ;;  %v1283_v49 = vpop.permute.xlu0 %1282  ;;  %v885_v46 = vld [vmem:[%s2270_s12] sm:$0xf] }
 0x217   : > { %v1285_v50 = vunpack.i.h.bf16 %v1283_v49  ;;  %v1284_v51 = vunpack.i.l.bf16 %v1283_v49  ;;  %1102 = vmatprep.subr.msk.bf16.mxu0 %vm1101_vm12, %v1100_v45  ;;  %vm718_vm12 = vmor %vm716_vm8, %vm713_vm7 }
 0x218   : > { %1105 = vmatpush1.bf16.msk.msra.mxu0 %vm1104_vm13, %v1103_v48  ;;  %vm747_vm13 = vcmask 252928  }
 0x219   : > { %v1106_v55 = vpack.c.bf16 %v1285_v50, %v1275_v43  ;;  %v585_v56 = vsel %vm568_vm11, %v1284_v51, %v1285_v50 }
 0x21a   : > { %v1293_v57 = vpop.permute.xlu0 %1292  ;;  %v1108_v58 = vpack.c.bf16 %v585_v56, %v576_v52 }
 0x21b   : > { %v1295_v59 = vunpack.i.h.bf16 %v1293_v57  ;;  %v1294_v60 = vunpack.i.l.bf16 %v1293_v57  ;;  %1107 = vmatprep.subr.bf16.mxu0 %v1106_v55 }
 0x21c   : > { %1109 = vmatpush1.bf16.msra.mxu0 %v1108_v58 }
 0x21d   : > { %v1110_v61 = vpack.c.bf16 %v1295_v59, %v1290_v53  ;;  %v600_v63 = vsel %vm592_vm14, %v1294_v60, %v1295_v59 }
 0x21e   : > { %v1112_v0 = vpack.c.bf16 %v600_v63, %v593_v62  ;;  %v606_v1 = vpop.permute.xlu0 %605 }
 0x21f   : > { %1111 = vmatprep.subr.bf16.mxu0 %v1110_v61  ;;  %v607_v4 = vsel %vm592_vm14, %v604_v2, %v606_v1 }
 0x220   : > { %1113 = vmatpush1.bf16.msra.mxu0 %v1112_v0 }
 0x221   : > { %630 = vmatprep.subr.mxu0 %v606_v1 }
 0x224   : > { %631 = vmatpush1.msra.mxu0 %v607_v4 }
 0x225   : > { %1067 = vmatmul.mubr.msk.f32.vlgmr.msra.gmra.mrb[0].mxu0 %vm610_vm15, %v497_v3 }
 0x226   : > { %v689_v5 = vpop.permute.xlu1 %688 }
 0x22f   : > { %v697_v9 = vpop.permute.xlu0 %696 }
 0x2f8   : > { %v680_v8 = vpop.f32.mrb[0].mxu0 }
 0x2f9   : > { %v691_v12 = vmul.f32 %v689_v5, %v680_v8  ;;  %v682_v13 = vpop.f32.mrb[1].mxu0 }
 0x2fa   : > { %v692_v14 = vmul.f32 %v689_v5, %v682_v13  ;;  %v727_v13 = vld [vmem:[%s2272_s20] sm:$0xf] }
 0x2fb   : > { %v699_v16 = vadd.f32 %v697_v9, %v691_v12 }
 0x2fc   : > { %v700_v17 = vadd.f32 %v697_v9, %v692_v14 }
 0x2fd   : > { %v701_v19 = vmax.f32 %v699_v16, 0.0 }
 0x2fe   : > { %v702_v21 = vmax.f32 %v700_v17, 0.0 }
 0x2ff   : > { %v725_v23 = vsel %vm709_vm10, %v701_v19, 0.0 }
 0x300   : > { %v726_v24 = vsel %vm718_vm12, %v702_v21, 0.0  ;;  %v751_v45 = vrot.slane %v725_v23, 4 }
 0x301   : > { %742 = vrot.lane.b32.xlu0 %v726_v24, %s1588_s8  ;;  %v1298_v25 = vpack.i.bf16 %v726_v24, %v725_v23  ;;  %v785_v22 = vrot.slane %v726_v24, 4 }
 0x303   : > { %1299 = vrot.lane.b32.xlu1 %v1298_v25, %s1589_s15  ;;  %v1323_v20 = vpack.i.bf16 %v785_v22, %v751_v45 }
 0x305   : > { %1304 = vrot.lane.b32.xlu0 %v1298_v25, %s1590_s9 }
 0x307   : > { %740 = vrot.lane.b32.xlu1 %v725_v23, %s1588_s8  ;;  %s910_s8 = sshll.u32 %s462_s7, 4  ;;  %s2111_s8 = int_to_ptr.vmem [resolvable:$true] %s910_s8 }
 0x308   : > { %s1424_s12 = scalar_lea.vmem %s2111_s8, 64 }
 0x309   : > { %p1425_p1 = scmp.ne.s32.totalorder %s2111_s8, %s1424_s12 }
 0x30b   : > { %p1426_p0 = pnand %p1425_p1, %p2274_p2 }
 0x30d   : > { %p1427_p7 = pneg %p1426_p0 }
 0x373   : > { %v743_v11 = vpop.permute.xlu0 %742 }
 0x374   : > { %v748_v31 = vsel %vm747_vm13, %v743_v11, 0.0 }
 0x375   : > { %v1300_v10 = vpop.permute.xlu1 %1299  ;;  %v750_v41 = vsel %vm2004_vm6, %v748_v31, 0.0 }
 0x376   : > { %v1302_v26 = vunpack.i.h.bf16 %v1300_v10  ;;  %v1301_v27 = vunpack.i.l.bf16 %v1300_v10  ;;  %v772_v43 = vrot.slane %v750_v41, 4 }
 0x377   : > { %v1305_v47 = vpop.permute.xlu0 %1304 }
 0x378   : > { %v737_v29 = vsel %vm533_vm1, 0.0, %v1301_v27  ;;  %v734_v30 = vsel %vm533_vm1, %v1301_v27, %v1302_v26  ;;  %vm1596_vm1 = vmmov 0   ;;  %v1307_v59 = vunpack.i.h.bf16 %v1305_v47 }
 0x379   : > { %v738_v32 = vsel %vm1999_vm3, %v737_v29, 0.0  ;;  %v741_v33 = vpop.permute.xlu1 %740  ;;  %v739_v34 = vsel %vm1995_vm2, %v734_v30, 0.0  ;;  %1091 = vmatprep.mubr.msk.f32.mxu1 %vm1596_vm1, %v1593_v35  ;;  %vm797_vm2 = vcmask 1043456   ;;  %v1306_v60 = vunpack.i.l.bf16 %v1305_v47 }
 0x37a   : > { %v744_v36 = vsel %vm550_vm4, %v741_v33, %v743_v11  ;;  %v1308_v37 = vpack.i.bf16 %v739_v34, %v738_v32  ;;  %v755_v38 = vrot.slane %v738_v32, 4  ;;  %v756_v39 = vrot.slane %v739_v34, 4 }
 0x37b   : > { %v749_v40 = vsel %vm2012_vm9, %v744_v36, 0.0  ;;  %v798_v54 = vsel %vm797_vm2, %v738_v32, %v751_v45  ;;  %v767_v3 = vsel %vm568_vm11, %v1306_v60, %v1307_v59  ;;  %vm802_vm3 = vcmask 293888  }
 0x37c   : > { %1309 = vrot.lane.b32.xlu0 %v1308_v37, %s1592_s5  ;;  %v1313_v42 = vpack.i.bf16 %v756_v39, %v755_v38  ;;  %v771_v18 = vrot.slane %v749_v40, 4 }
 0x37e   : > { %1314 = vrot.lane.b32.xlu1 %v1313_v42, %s1590_s9  ;;  %v1318_v15 = vpack.i.bf16 %v772_v43, %v771_v18 }
 0x380   : > { %792 = vrot.lane.b32.xlu0 %v749_v40, %s1592_s5 }
 0x382   : > { %1319 = vrot.lane.b32.xlu1 %v1318_v15, %s1590_s9  ;;  %s2271_s9 = sld [smem:[#allocation15_spill]] }
 0x384   : > { %881 = vperm.xlu0 %1297, %v878_v44  }
 0x386   : > { %1324 = vrot.lane.b32.xlu1 %v1323_v20, %s1592_s5 }
 0x388   : > { %s1071_s24 = sshll.u32 %s2271_s9, 1  ;;  %s1597_s9 = smov [#allocation8]  }
 0x389   : > { %s906_s30 = sadd.s32 %s2257_s23, %s1071_s24  ;;  %s895_s23 = scalar_lea.sflag [#allocation4], %s1970_s26 }
 0x38a   : > { %794 = vrot.lane.b32.xlu1 %v750_v41, %s1592_s5  ;;  %s1072_s27 = sshll.u32 %s906_s30, 6  ;;  %s1428_s5 = sshll.u32 %s1597_s9, 4  ;;  %s1429_s5 = int_to_ptr.vmem [resolvable:$false] %s1428_s5 }
 0x38b   : > { %s2109_s3 = scalar_lea.hbm %s2273_s25, %s1072_s27  ;;  %s1430_s1 = scalar_lea.vmem %s1429_s5, 128 }
 0x38c   : > { %p1431_p8 = scmp.lt.s32.totalorder %s2111_s8, %s1429_s5  ;;  %p1432_p3 = scmp.lt.s32.totalorder %s1430_s1, %s1424_s12 }
 0x38e   : > { %888 = vperm.xlu1 %1296, %v885_v46   ;;  %p1433_p11 = por %p1432_p3, %p1431_p8 }
 0x390   : > { %p1434_p4 = pnand %p1433_p11, %p1427_p7 }
 0x3ee   : > { %v1310_v52 = vpop.permute.xlu0 %1309 }
 0x3ef   : > { %v1312_v61 = vunpack.i.h.bf16 %v1310_v52  ;;  %v1311_v62 = vunpack.i.l.bf16 %v1310_v52 }
 0x3f0   : > { %v1315_v48 = vpop.permute.xlu1 %1314 }
 0x3f1   : > { %v1317_v49 = vunpack.i.h.bf16 %v1315_v48  ;;  %v1316_v50 = vunpack.i.l.bf16 %v1315_v48  ;;  %v783_v4 = vsel %vm592_vm14, %v1311_v62, %v1312_v61 }
 0x3f2   : > { %v793_v12 = vpop.permute.xlu0 %792 }
 0x3f3   : > { %v761_v51 = vsel %vm568_vm11, %v1316_v50, %v1317_v49 }
 0x3f4   : > { %v1320_v53 = vpop.permute.xlu1 %1319  ;;  %v799_v55 = vsel %vm797_vm2, %v749_v40, %v761_v51 }
 0x3f5   : > { %v1322_v56 = vunpack.i.h.bf16 %v1320_v53  ;;  %v1321_v57 = vunpack.i.l.bf16 %v1320_v53  ;;  %v1115_v58 = vpack.c.bf16 %v799_v55, %v798_v54 }
 0x3f7   : > { %1116 = vmatpush3.bf16.msra.mxu1 %v1115_v58  ;;  %v777_v0 = vsel %vm568_vm11, %v1321_v57, %v1322_v56 }
 0x3f8   : > { %v1325_v63 = vpop.permute.xlu1 %1324  ;;  %1117 = vmatprep.subr.bf16.mxu1 %v1595_v28  ;;  %v800_v6 = vsel %vm797_vm2, %v767_v3, %v777_v0 }
 0x3f9   : > { %v1327_v1 = vunpack.i.h.bf16 %v1325_v63  ;;  %v1326_v2 = vunpack.i.l.bf16 %v1325_v63 }
 0x3fb   : > { %v790_v5 = vsel %vm592_vm14, %v1326_v2, %v1327_v1 }
 0x3fc   : > { %v801_v7 = vsel %vm797_vm2, %v783_v4, %v790_v5  ;;  %v795_v9 = vpop.permute.xlu1 %794 }
 0x3fd   : > { %v1118_v8 = vpack.c.bf16 %v801_v7, %v800_v6  ;;  %v796_v14 = vsel %vm592_vm14, %v793_v12, %v795_v9 }
 0x3ff   : > { %1119 = vmatpush3.bf16.msra.mxu1 %v1118_v8 }
 0x400   : > { %1089 = vmatprep.subr.mxu1 %v1593_v35 }
 0x403   : > { %1090 = vmatpush3.msk.msra.mxu1 %vm797_vm2, %v796_v14  ;;  %v882_v16 = vpop.permute.xlu0 %881 }
 0x404   : > { %1092 = vmatmul.mubr.msk.f32.vlgmr.msra.gmra.mrb[0].mxu1 %vm802_vm3, %v727_v13 }
 0x40d   : > { %v889_v21 = vpop.permute.xlu1 %888 }
 0x4d7   : > { %v874_v17 = vpop.f32.mrb[0].mxu1 }
 0x4d8   : > { %v884_v19 = vmul.f32 %v882_v16, %v874_v17  ;;  %v1093_v35 = vpop.f32.mrb[1].mxu1 }
 0x4da   : > { %v891_v23 = vadd.f32 %v889_v21, %v884_v19 }
 0x4dc   : > { %v892_v24 = vmax.f32 %v891_v23, 0.0 }
 0x4de   : > { %893 = vst [vmem:[%s462_s7] sm:$0xf] %v892_v24 }
 0x4df   : > { %1437 = shalt.err (!%p1434_p4)
}
 0x4e0   : > { %s1438_s26 = scalar_lea.hbm %s2109_s3, 64  ;;  %s1442_s24 = scalar_lea.hbm %s2273_s25, 256 }
 0x4e1   : > { %p1439_p10 = scmp.ne.s32.totalorder %s2109_s3, %s1438_s26  ;;  %p1443_p5 = scmp.lt.u32.totalorder %s2109_s3, %s2273_s25 }
 0x4e2   : > { %p1444_p13 = scmp.lt.u32.totalorder %s1442_s24, %s1438_s26  ;;  %p1446_p1 = scmp.lt.u32.totalorder %s1438_s26, %s2109_s3 }
 0x4e3   : > { %p1440_p6 = pnand %p1439_p10, %p2274_p2 }
 0x4e4   : > { %p1445_p12 = por %p1444_p13, %p1443_p5 }
 0x4e5   : > { %p1441_p9 = pneg %p1440_p6 }
 0x4e6   : > { %p1447_p0 = por %p1446_p1, %p1445_p12 }
 0x4e8   : > { %p1448_p7 = pnand %p1447_p0, %p1441_p9 }
 0x4ea   : > { %1451 = shalt.err (!%p1448_p7)
}
 0x4eb   : > { %1126 = dma.vmem_to_hbm [thread:$0]  (%p2274_p2), %s2111_s8, 64, %s2109_s3, %s895_s23  }
 0x4ec PF: > { %s2275_s7 = sld [smem:[#allocation13_spill]]  ;;  %s2276_s15 = sld [smem:[#allocation19_spill]] }
 0x4ed   : > { %p1143_p8 = scmp.ge.s32.totalorder %s1582_s22, 2 }
 0x4f2   : > { %s922_s4 = sand.u32 1, %s2275_s7   ;;  %p2277_p3 = scmp.ne.s32.totalorder %s2276_s15, 0 }
 0x4f3   : > { %s923_s12 = scalar_lea.sflag [#allocation4], %s922_s4 }
 0x4f4   : > { %p1139_p11 = pnand %p1143_p8, %p2277_p3 }
 0x4f6   : > { %1521 = dma.done.wait (!%p1139_p11), %s923_s12, 64  }
 0x4f7   : > { %1523 = vsyncadd (!%p1139_p11), %s923_s12, 4294967232  ;;  %s28_s22 = sadd.s32 1, %s1582_s22   ;;  %s2279_s18 = sld [smem:[#allocation16_spill]] }
 0x4f8   : > { %p2140_p4 = scmp.ge.s32.totalorder %s28_s22, 6   ;;  %s2280_s20 = sld [smem:[#allocation17_spill]] }
 0x4f9   : > { %s2281_s28 = sld [smem:[#allocation20_spill]]  ;;  %s2282_s30 = smov %s1534_s10 }
 0x4fa   : > { %s2283_s10 = smov %s1538_s11  ;;  %s2284_s11 = smov %s1918_s19 }
 0x4fb   : > { %s2285_s12 = smov %s1546_s13  ;;  %s2286_s13 = smov %s1550_s14 }
 0x4fc   : > { %s2287_s14 = smov %s1856_s29  ;;  %s2288_s15 = smov %s1558_s16 }
 0x4fd   : > { %s2289_s16 = smov %s1562_s17  ;;  %s2290_s17 = smov %s1851_s6 }
 0x4fe   : > { %s2291_s19 = smov %s1578_s21  ;;  %27 = sbr.rel (!%p2140_p4) target bundleno = 21 (0x15), region = 125 }
 0x4ff   : > { %s2292_s21 = smov %s2281_s28 }
 0x505   :  { %928 = vsyncpa [#allocation3], 1 }
 0x506   :  { %930 = vsyncpa [#allocation3 + $0x1], 1 }
 0x507   :  { %931 = vsyncpa [#allocation6], 1 }
 0x508   :  { %933 = vsyncpa [#allocation6 + $0x1], 1 }
 0x509   :  { %934 = vsyncpa [#allocation4], 1 }
 0x50a   :  { %936 = vsyncpa [#allocation4 + $0x1], 1 }

</bundles_post_ra>
